<compile_context>
chip_gen: v6e
topology: v6e:2x2x1
jax: 0.10.0
libtpu: 0.0.40
codegen_flags: <defaults>
</compile_context>

<pallas_src>
import numpy as np

import jax
import jax.numpy as jnp
from jax.experimental import pallas as pl
from jax.experimental.pallas import tpu as pltpu


def _round_up(x, m):
    return ((x + m - 1) // m) * m


def generator_kernel(z_ref, w1_ref, b1_ref, w2_ref, b2_ref, out_ref):
    # First linear: bf16 operands, f32 accumulation on the MXU.
    z_bf = z_ref[...].astype(jnp.bfloat16)
    h = jnp.dot(z_bf, w1_ref[...], preferred_element_type=jnp.float32)
    # Bias add + ReLU in f32 (b1 is (1, hidden) -> broadcasts over batch tile).
    h = jnp.maximum(h + b1_ref[...], 0.0)
    # Second linear: cast the activation to bf16, accumulate in f32.
    o = jnp.dot(h.astype(jnp.bfloat16), w2_ref[...],
                preferred_element_type=jnp.float32)
    o = o + b2_ref[...]
    out_ref[...] = jnp.tanh(o)


def generator_forward(z, w1_t, b1, w2_t, b2, output_shape, *, tm=128):
    """Fused Generator forward.

    z    : (B, latent_dim) f32
    w1_t : (latent_dim, hidden) bf16   (PyTorch fc[0].weight.T)
    b1   : (1, hidden) f32
    w2_t : (hidden, out_dim) bf16      (PyTorch fc[2].weight.T)
    b2   : (1, out_dim) f32
    Returns (B, *output_shape) f32.
    """
    B, latent_dim = z.shape
    hidden = w1_t.shape[1]
    out_dim = w2_t.shape[1]

    # ---- lane-dense output: pad out_dim up to a multiple of 128 -------------
    out_pad = _round_up(out_dim, 128)
    if out_pad != out_dim:
        w2_t = jnp.pad(w2_t, ((0, 0), (0, out_pad - out_dim)))
        b2 = jnp.pad(b2, ((0, 0), (0, out_pad - out_dim)))

    # ---- batch tiling: multiple of 8 (f32 sublane), up to `tm` (>=128) ------
    TM = min(tm, _round_up(B, 8))
    B_pad = _round_up(B, TM)
    if B_pad != B:
        z = jnp.pad(z, ((0, B_pad - B), (0, 0)))
    grid = (B_pad // TM,)

    # ---- VMEM budget (double-buffered inputs + resident weights + h) -------
    vmem_bytes = 2 * (
        latent_dim * hidden * 2          # w1 (bf16)
        + hidden * out_pad * 2           # w2 (bf16)
        + hidden * 4 + out_pad * 4       # biases (f32)
        + TM * latent_dim * 4            # z tile (f32)
        + TM * out_pad * 4               # out tile (f32)
    ) + TM * hidden * 4                  # intermediate h (f32)
    vmem_limit = int(min(max(2 * vmem_bytes, 16 << 20), 48 << 20))

    flat = pl.pallas_call(
        generator_kernel,
        out_shape=jax.ShapeDtypeStruct((B_pad, out_pad), jnp.float32),
        grid=grid,
        in_specs=[
            pl.BlockSpec((TM, latent_dim), lambda i: (i, 0)),      # z tile
            pl.BlockSpec((latent_dim, hidden), lambda i: (0, 0)),  # w1 resident
            pl.BlockSpec((1, hidden), lambda i: (0, 0)),           # b1 resident
            pl.BlockSpec((hidden, out_pad), lambda i: (0, 0)),     # w2 resident
            pl.BlockSpec((1, out_pad), lambda i: (0, 0)),          # b2 resident
        ],
        out_specs=pl.BlockSpec((TM, out_pad), lambda i: (i, 0)),
        compiler_params=pltpu.CompilerParams(
            dimension_semantics=("parallel",),
            vmem_limit_bytes=vmem_limit,
        ),
    )(z, w1_t, b1, w2_t, b2)

    # Strip batch / out_dim padding, reshape to the module's output shape.
    out = flat[:B, :out_dim]
    return out.reshape((B,) + tuple(output_shape))


def init_params(key, latent_dim, hidden, out_dim):
    """Deterministic synthetic init (mimics nn.Linear's uniform fan-in init).

    Weights are stored pre-transposed ((in, out) == PyTorch weight.T) and cast
    to bf16 for the MXU; biases stay f32.
    """
    k1, k2, k3, k4 = jax.random.split(key, 4)
    bound1 = 1.0 / np.sqrt(latent_dim)
    bound2 = 1.0 / np.sqrt(hidden)
    w1_t = jax.random.uniform(k1, (latent_dim, hidden), jnp.float32, -bound1, bound1)
    b1 = jax.random.uniform(k2, (1, hidden), jnp.float32, -bound1, bound1)
    w2_t = jax.random.uniform(k3, (hidden, out_dim), jnp.float32, -bound2, bound2)
    b2 = jax.random.uniform(k4, (1, out_dim), jnp.float32, -bound2, bound2)
    return w1_t.astype(jnp.bfloat16), b1, w2_t.astype(jnp.bfloat16), b2


if __name__ == "__main__":
    # Small, forward-consistent shapes
    batch = 2
    latent_dim = 32
    hidden = 1024                      # fixed by the module definition
    output_shape = (1, 16, 8)          # prod = 128
    out_dim = int(np.prod(output_shape))

    key = jax.random.PRNGKey(0)
    kz, kp = jax.random.split(key)
    z = jax.random.normal(kz, (batch, latent_dim), dtype=jnp.float32)
    w1_t, b1, w2_t, b2 = init_params(kp, latent_dim, hidden, out_dim)

    out = generator_forward(z, w1_t, b1, w2_t, b2, output_shape)
    out = jax.block_until_ready(out)

    # Reference with matching bf16-operand / f32-accumulate math in plain JAX.
    h_ref = jnp.maximum(
        jnp.dot(z.astype(jnp.bfloat16), w1_t,
                preferred_element_type=jnp.float32) + b1, 0.0)
    o_ref = jnp.dot(h_ref.astype(jnp.bfloat16), w2_t,
                    preferred_element_type=jnp.float32) + b2
    ref = jnp.tanh(o_ref).reshape((batch,) + output_shape)

    assert out.shape == (batch,) + output_shape
    np.testing.assert_allclose(np.asarray(out), np.asarray(ref),
                               rtol=2e-2, atol=2e-2)

    print("KERNEL_OK")
</pallas_src>

<mosaic_0001>
module attributes {stable_mosaic.version = 11 : i64} {
  func.func @generator_kernel(%arg0: i32, %arg1: memref<8x32xf32, #tpu.memory_space<vmem>>, %arg2: memref<32x1024xbf16, #tpu.memory_space<vmem>>, %arg3: memref<1x1024xf32, #tpu.memory_space<vmem>>, %arg4: memref<1024x128xbf16, #tpu.memory_space<vmem>>, %arg5: memref<1x128xf32, #tpu.memory_space<vmem>>, %arg6: memref<8x128xf32, #tpu.memory_space<vmem>>) attributes {dimension_semantics = [#tpu.dimension_semantics<parallel>], iteration_bounds = array<i64: 1>, scalar_prefetch = 0 : i64, scratch_operands = 0 : i64, tpu.core_type = #tpu.core_type<tc>, window_params = [{transform_indices = @transform_0, window_bounds = array<i64: 8, 32>}, {pipeline_mode = #tpu.pipeline_mode<synchronous>, transform_indices = @transform_1, window_bounds = array<i64: 32, 1024>}, {pipeline_mode = #tpu.pipeline_mode<synchronous>, transform_indices = @transform_2, window_bounds = array<i64: 1, 1024>}, {pipeline_mode = #tpu.pipeline_mode<synchronous>, transform_indices = @transform_3, window_bounds = array<i64: 1024, 128>}, {pipeline_mode = #tpu.pipeline_mode<synchronous>, transform_indices = @transform_4, window_bounds = array<i64: 1, 128>}, {transform_indices = @transform_5, window_bounds = array<i64: 8, 128>}]} {
    %c0 = arith.constant 0 : index
    %c0_0 = arith.constant 0 : index
    %0 = vector.load %arg1[%c0, %c0_0] : memref<8x32xf32, #tpu.memory_space<vmem>>, vector<8x32xf32>
    %1 = arith.truncf %0 : vector<8x32xf32> to vector<8x32xbf16>
    %c0_1 = arith.constant 0 : index
    %c0_2 = arith.constant 0 : index
    %2 = vector.load %arg2[%c0_1, %c0_2] : memref<32x1024xbf16, #tpu.memory_space<vmem>>, vector<32x1024xbf16>
    %cst = arith.constant dense<0.000000e+00> : vector<8x1024xf32>
    %3 = tpu.matmul %1, %2, %cst {dimension_numbers = #tpu.dot_dimension_numbers<[1], [0], [0], [1], [0, 0, 1, 1], [], []>} : vector<8x32xbf16>, vector<32x1024xbf16>, vector<8x1024xf32> -> vector<8x1024xf32>
    %c0_3 = arith.constant 0 : index
    %c0_4 = arith.constant 0 : index
    %4 = vector.load %arg3[%c0_3, %c0_4] : memref<1x1024xf32, #tpu.memory_space<vmem>>, vector<1x1024xf32>
    %5 = vector.broadcast %4 : vector<1x1024xf32> to vector<8x1024xf32>
    %6 = arith.addf %3, %5 : vector<8x1024xf32>
    %cst_5 = arith.constant 0.000000e+00 : f32
    %7 = vector.broadcast %cst_5 : f32 to vector<8x1024xf32>
    %8 = arith.maximumf %6, %7 : vector<8x1024xf32>
    %9 = arith.truncf %8 : vector<8x1024xf32> to vector<8x1024xbf16>
    %c0_6 = arith.constant 0 : index
    %c0_7 = arith.constant 0 : index
    %10 = vector.load %arg4[%c0_6, %c0_7] : memref<1024x128xbf16, #tpu.memory_space<vmem>>, vector<1024x128xbf16>
    %cst_8 = arith.constant dense<0.000000e+00> : vector<8x128xf32>
    %11 = tpu.matmul %9, %10, %cst_8 {dimension_numbers = #tpu.dot_dimension_numbers<[1], [0], [0], [1], [0, 0, 1, 1], [], []>} : vector<8x1024xbf16>, vector<1024x128xbf16>, vector<8x128xf32> -> vector<8x128xf32>
    %c0_9 = arith.constant 0 : index
    %c0_10 = arith.constant 0 : index
    %12 = vector.load %arg5[%c0_9, %c0_10] : memref<1x128xf32, #tpu.memory_space<vmem>>, vector<1x128xf32>
    %13 = vector.broadcast %12 : vector<1x128xf32> to vector<8x128xf32>
    %14 = arith.addf %11, %13 : vector<8x128xf32>
    %15 = math.tanh %14 : vector<8x128xf32>
    %c0_11 = arith.constant 0 : index
    %c0_12 = arith.constant 0 : index
    %16 = vector.load %arg6[%c0_11, %c0_12] : memref<8x128xf32, #tpu.memory_space<vmem>>, vector<8x128xf32>
    tpu.vector_store %arg6[%c0_11, %c0_12], %15 {strides = array<i32>} : memref<8x128xf32, #tpu.memory_space<vmem>>, vector<8x128xf32>,
    return
  }
  func.func @transform_0(%arg0: i32) -> (i32, i32) {
    %c0_i32 = arith.constant 0 : i32
    %c0_i32_0 = arith.constant 0 : i32
    return %arg0, %c0_i32 : i32, i32
  }
  func.func @transform_1(%arg0: i32) -> (i32, i32) {
    %c0_i32 = arith.constant 0 : i32
    %c0_i32_0 = arith.constant 0 : i32
    %c0_i32_1 = arith.constant 0 : i32
    return %c0_i32, %c0_i32_0 : i32, i32
  }
  func.func @transform_2(%arg0: i32) -> (i32, i32) {
    %c0_i32 = arith.constant 0 : i32
    %c0_i32_0 = arith.constant 0 : i32
    %c0_i32_1 = arith.constant 0 : i32
    return %c0_i32, %c0_i32_0 : i32, i32
  }
  func.func @transform_3(%arg0: i32) -> (i32, i32) {
    %c0_i32 = arith.constant 0 : i32
    %c0_i32_0 = arith.constant 0 : i32
    %c0_i32_1 = arith.constant 0 : i32
    return %c0_i32, %c0_i32_0 : i32, i32
  }
  func.func @transform_4(%arg0: i32) -> (i32, i32) {
    %c0_i32 = arith.constant 0 : i32
    %c0_i32_0 = arith.constant 0 : i32
    %c0_i32_1 = arith.constant 0 : i32
    return %c0_i32, %c0_i32_0 : i32, i32
  }
  func.func @transform_5(%arg0: i32) -> (i32, i32) {
    %c0_i32 = arith.constant 0 : i32
    %c0_i32_0 = arith.constant 0 : i32
    return %arg0, %c0_i32 : i32, i32
  }
}

</mosaic_0001>

<bundles_post_ra>
// kernel: tpu_custom_call.1
= control target key start
LH: loop header
LB: loop body
LE: loop exit
PB: predicated region body
PF: predicated region fallthrough
CT: control target
= control target key end

     0   :  { %10 = vsyncpa [#allocation3], 0  ;;  %s1537_s0 = inlined_call_operand.hbm [shape: f32[8,32], index: 0, kind: input, shape index: {}]   ;;  %s1538_s1 = inlined_call_operand.hbm [shape: bf16[32,1024], index: 1, kind: input, shape index: {}]   ;;  %s1539_s2 = inlined_call_operand.hbm [shape: f32[1,1024], index: 2, kind: input, shape index: {}]   ;;  %s1540_s3 = inlined_call_operand.hbm [shape: bf16[1024,128], index: 3, kind: input, shape index: {}]   ;;  %s1541_s4 = inlined_call_operand.vmem [shape: f32[1,128], index: 4, kind: input, shape index: {}]   ;;  %s1542_s5 = inlined_call_operand.hbm [shape: f32[8,128], index: 5, kind: output, shape index: {}]  }
   0x1   :  { %11 = vsyncpa [#allocation6], 0 }
   0x2   :  { %12 = vsyncpa [#allocation9], 0 }
   0x3   :  { %13 = vsyncpa [#allocation4], 0  ;;  %s1452_s18 = smov [#allocation5]  }
   0x4   :  { %s29_s19 = sshll.u32 %s1452_s18, 4  ;;  %s30_s19 = int_to_ptr.vmem [resolvable:$true] %s29_s19 }
   0x5   :  { %s1352_s20 = scalar_lea.vmem %s30_s19, 2048  ;;  %p1357_p1 = scmp.lt.s32.totalorder %s30_s19, %s30_s19 }
   0x6   :  { %p1353_p0 = scmp.ne.s32.totalorder %s30_s19, %s1352_s20  ;;  %p1358_p2 = scmp.lt.s32.totalorder %s1352_s20, %s1352_s20 }
   0x8   :  { %p1359_p3 = por %p1358_p2, %p1357_p1 }
   0xa   :  { %p1360_p4 = pnand %p1359_p3, %p1353_p0 }
   0xc   :  { %1363 = shalt.err (!%p1360_p4)
}
   0xd   :  { %s1453_s21 = smov 512   ;;  %s1454_s22 = smov 32  }
   0xe   :  { %35 = dma.hbm_to_vmem [thread:$0]  %s1538_s1, 2048, %s30_s19, [#allocation6], %s1453_s21, %s1453_s21, %s1454_s22  }
   0xf   :  { %s1455_s25 = smov [#allocation2]   ;;  %s1456_s27 = smov [#allocation7]  }
  0x10   :  { %s20_s26 = sshll.u32 %s1455_s25, 4  ;;  %s42_s28 = sshll.u32 %s1456_s27, 4  ;;  %s21_s26 = int_to_ptr.vmem [resolvable:$true] %s20_s26  ;;  %s43_s28 = int_to_ptr.vmem [resolvable:$true] %s42_s28 }
  0x11   :  { %s1372_s29 = scalar_lea.vmem %s21_s26, 128  ;;  %p1377_p6 = scmp.lt.s32.totalorder %s21_s26, %s21_s26 }
  0x12   :  { %p1373_p5 = scmp.ne.s32.totalorder %s21_s26, %s1372_s29  ;;  %p1378_p7 = scmp.lt.s32.totalorder %s1372_s29, %s1372_s29 }
  0x14   :  { %p1379_p8 = por %p1378_p7, %p1377_p6 }
  0x16   :  { %p1380_p9 = pnand %p1379_p8, %p1373_p5 }
  0x18   :  { %1383 = shalt.err (!%p1380_p9)
}
  0x19   :  { %23 = dma.hbm_to_vmem [thread:$0]  %s1537_s0, 128, %s21_s26, [#allocation3]  }
  0x1a   :  { %s1392_s7 = scalar_lea.vmem %s43_s28, 128  ;;  %p1397_p11 = scmp.lt.s32.totalorder %s43_s28, %s43_s28 }
  0x1b   :  { %p1393_p10 = scmp.ne.s32.totalorder %s43_s28, %s1392_s7  ;;  %p1398_p12 = scmp.lt.s32.totalorder %s1392_s7, %s1392_s7 }
  0x1d   :  { %p1399_p13 = por %p1398_p12, %p1397_p11 }
  0x1f   :  { %p1400_p0 = pnand %p1399_p13, %p1393_p10 }
  0x21   :  { %1403 = shalt.err (!%p1400_p0)
}
  0x22   :  { %45 = dma.hbm_to_vmem [thread:$0]  %s1539_s2, 128, %s43_s28, [#allocation6]  }
  0x23   :  { %s1457_s9 = smov [#allocation8]  }
  0x24   :  { %s51_s10 = sshll.u32 %s1457_s9, 4  ;;  %s52_s10 = int_to_ptr.vmem [resolvable:$true] %s51_s10 }
  0x25   :  { %s1412_s11 = scalar_lea.vmem %s52_s10, 8192  ;;  %p1417_p2 = scmp.lt.s32.totalorder %s52_s10, %s52_s10 }
  0x26   :  { %p1413_p1 = scmp.ne.s32.totalorder %s52_s10, %s1412_s11  ;;  %p1418_p3 = scmp.lt.s32.totalorder %s1412_s11, %s1412_s11 }
  0x28   :  { %p1419_p4 = por %p1418_p3, %p1417_p2 }
  0x2a   :  { %p1420_p5 = pnand %p1419_p4, %p1413_p1 }
  0x2c   :  { %1423 = shalt.err (!%p1420_p5)
}
  0x2d   :  { %s1458_s0 = smov 64   ;;  %s1459_s12 = smov 4  }
  0x2e   :  { %57 = dma.hbm_to_vmem [thread:$0]  %s1540_s3, 8192, %s52_s10, [#allocation9], %s1458_s0, %s1458_s0, %s1459_s12  }
  0x2f   :  { %1444 = dma.done.wait [#allocation3], 128  }
  0x30   :  { %1445 = vsyncadd [#allocation3], 4294967168 }
  0x31   :  { %1446 = dma.done.wait [#allocation6], 2176  }
  0x32   :  { %1447 = vsyncadd [#allocation6], 4294965120 }
  0x33   :  { %1448 = dma.done.wait [#allocation9], 8192  }
  0x34   :  { %1449 = vsyncadd [#allocation9], 4294959104  ;;  %v1460_v0 = vmov 0   ;;  %v83_v1 = vld [vmem:[#allocation5 + $0x40] sm:$0xff]  ;;  %v84_v3 = vld [vmem:[#allocation5 + $0x48] sm:$0xff]  ;;  %vm213_vm0 = vcmask 261120  }
  0x35   :  { %249 = vmatprep.mubr.bf16.mxu0 %v1460_v0  ;;  %290 = vmatprep.mubr.bf16.mxu1 %v1460_v0  ;;  %v87_v2 = vld [vmem:[#allocation5 + $0x60] sm:$0xff]  ;;  %v88_v5 = vld [vmem:[#allocation5 + $0x68] sm:$0xff]  ;;  %v85_v15 = vld [vmem:[#allocation5 + $0x50] sm:$0xff]  ;;  %s1461_s15 = smov [#allocation10]  }
  0x36   :  { %v1104_v4 = vcombine.high %v83_v1, %v87_v2  ;;  %v1103_v6 = vcombine.low %v83_v1, %v87_v2  ;;  %v75_v7 = vld [vmem:[#allocation5] sm:$0xff]  ;;  %v1106_v9 = vcombine.high %v84_v3, %v88_v5  ;;  %v1105_v10 = vcombine.low %v84_v3, %v88_v5  ;;  %v76_v12 = vld [vmem:[#allocation5 + $0x8] sm:$0xff]  ;;  %v89_v16 = vld [vmem:[#allocation5 + $0x70] sm:$0xff]  ;;  %s1084_s16 = sshll.u32 %s1461_s15, 4  ;;  %s1085_s16 = int_to_ptr.vmem [resolvable:$true] %s1084_s16 }
  0x37   :  { %v79_v8 = vld [vmem:[#allocation5 + $0x20] sm:$0xff]  ;;  %v80_v13 = vld [vmem:[#allocation5 + $0x28] sm:$0xff]  ;;  %v86_v17 = vld [vmem:[#allocation5 + $0x58] sm:$0xff]  ;;  %v1108_v22 = vcombine.high %v85_v15, %v89_v16  ;;  %v1107_v29 = vcombine.low %v85_v15, %v89_v16  ;;  %v93_v5 = vlaneseq  ;;  %p1429_p7 = scmp.lt.s32.totalorder %s1085_s16, %s1085_s16 }
  0x38   :  { %v1096_v11 = vcombine.high %v75_v7, %v79_v8  ;;  %229 = vmatprep.subr.bf16.mxu0 %v1104_v4  ;;  %v1098_v14 = vcombine.high %v76_v12, %v80_v13  ;;  %270 = vmatprep.subr.bf16.mxu1 %v1106_v9  ;;  %v1095_v18 = vcombine.low %v75_v7, %v79_v8  ;;  %v73_v19 = vld [vmem:[#allocation2] sm:$0xff]  ;;  %v77_v23 = vld [vmem:[#allocation5 + $0x10] sm:$0xff]  ;;  %v1278_v35 = vld [vmem:[#allocation8 + $0x78] sm:$0xff]  }
  0x39   :  { %230 = vmatpush1.bf16.msra.mxu0 %v1103_v6  ;;  %v90_v20 = vld [vmem:[#allocation5 + $0x78] sm:$0xff]  ;;  %271 = vmatpush1.bf16.msra.mxu1 %v1105_v10  ;;  %v1097_v21 = vcombine.low %v76_v12, %v80_v13  ;;  %v81_v24 = vld [vmem:[#allocation5 + $0x30] sm:$0xff]  ;;  %v74_v27 = vpack.c.bf16 %v73_v19, %v73_v19  ;;  %v1279_v36 = vld [vmem:[#allocation8 + $0xf8] sm:$0xff]   ;;  %v1508_v6 = vshrl.u32 %v93_v5, 7 }
  0x3a   :  { %231 = vmatprep.subr.bf16.mxu0 %v1096_v11  ;;  %272 = vmatprep.subr.bf16.mxu1 %v1098_v14  ;;  %v1110_v25 = vcombine.high %v86_v17, %v90_v20  ;;  %v78_v26 = vld [vmem:[#allocation5 + $0x18] sm:$0xff]  ;;  %v1109_v30 = vcombine.low %v86_v17, %v90_v20  ;;  %v1100_v31 = vcombine.high %v77_v23, %v81_v24  ;;  %v1280_v37 = vld [vmem:[#allocation8 + $0x38] sm:$0xff]   ;;  %v1286_v43 = vld [vmem:[#allocation8 + $0x68] sm:$0xff]  }
  0x3b   :  { %v82_v28 = vld [vmem:[#allocation5 + $0x38] sm:$0xff]  ;;  %v1099_v33 = vcombine.low %v77_v23, %v81_v24  ;;  %v1281_v38 = vld [vmem:[#allocation8 + $0xb8] sm:$0xff]   ;;  %v1287_v44 = vld [vmem:[#allocation8 + $0xe8] sm:$0xff]   ;;  %v95_v7 = vsub.s32 0, %v1508_v6  ;;  %v103_v9 = vsub.s32 2, %v1508_v6  ;;  %v99_v10 = vsub.s32 1, %v1508_v6 }
  0x3c   :  { %v1102_v32 = vcombine.high %v78_v26, %v82_v28  ;;  %v1101_v34 = vcombine.low %v78_v26, %v82_v28  ;;  %v1282_v39 = vld [vmem:[#allocation8 + $0x70] sm:$0xff]   ;;  %v1288_v45 = vld [vmem:[#allocation8 + $0x28] sm:$0xff]   ;;  %v1290_v47 = vld [vmem:[#allocation8 + $0x60] sm:$0xff]   ;;  %v107_v11 = vsub.s32 3, %v1508_v6  ;;  %v115_v23 = vsub.s32 5, %v1508_v6 }
  0x3d   :  { %232 = vmatpush1.bf16.msra.mxu0 %v1095_v18  ;;  %273 = vmatpush1.bf16.msra.mxu1 %v1097_v21  ;;  %v1283_v40 = vld [vmem:[#allocation8 + $0xf0] sm:$0xff]   ;;  %v1289_v46 = vld [vmem:[#allocation8 + $0xa8] sm:$0xff]   ;;  %v1291_v48 = vld [vmem:[#allocation8 + $0xe0] sm:$0xff]   ;;  %v123_v28 = vsub.s32 7, %v1508_v6 }
  0x3e   :  { %311 = vmatprep.subr.bf16.mxu0 %v1108_v22  ;;  %352 = vmatprep.subr.bf16.mxu1 %v1110_v25  ;;  %v1284_v41 = vld [vmem:[#allocation8 + $0x30] sm:$0xff]   ;;  %v1292_v49 = vld [vmem:[#allocation8 + $0x20] sm:$0xff]   ;;  %v1294_v51 = vld [vmem:[#allocation8 + $0x58] sm:$0xff]  }
  0x3f   :  { %v1285_v42 = vld [vmem:[#allocation8 + $0xb0] sm:$0xff]   ;;  %v1293_v50 = vld [vmem:[#allocation8 + $0xa0] sm:$0xff]   ;;  %v1295_v52 = vld [vmem:[#allocation8 + $0xd8] sm:$0xff]  }
  0x40   :  { %1111 = vmatmul.mubr.msk.bf16.vlgmr.msra.gmra.mxu0 %vm213_vm0, %v74_v27  ;;  %1112 = vmatmul.mubr.msk.bf16.vlgmr.msra.gmra.mxu1 %vm213_vm0, %v74_v27  ;;  %v1296_v53 = vld [vmem:[#allocation8 + $0x18] sm:$0xff]   ;;  %v1298_v55 = vld [vmem:[#allocation8 + $0x50] sm:$0xff]   ;;  %v1302_v59 = vld [vmem:[#allocation8 + $0x48] sm:$0xff]  }
  0x41   :  { %312 = vmatpush1.bf16.msra.mxu0 %v1107_v29  ;;  %353 = vmatpush1.bf16.msra.mxu1 %v1109_v30  ;;  %v1297_v54 = vld [vmem:[#allocation8 + $0x98] sm:$0xff]   ;;  %v1299_v56 = vld [vmem:[#allocation8 + $0xd0] sm:$0xff]   ;;  %v1303_v60 = vld [vmem:[#allocation8 + $0xc8] sm:$0xff]  }
  0x42   :  { %313 = vmatprep.subr.bf16.mxu0 %v1100_v31  ;;  %354 = vmatprep.subr.bf16.mxu1 %v1102_v32  ;;  %v1300_v57 = vld [vmem:[#allocation8 + $0x10] sm:$0xff]   ;;  %v1304_v61 = vld [vmem:[#allocation8 + $0x8] sm:$0xff]   ;;  %v1306_v63 = vld [vmem:[#allocation8 + $0x40] sm:$0xff]  }
  0x43   :  { %331 = vmatprep.mubr.bf16.mxu0 %v1460_v0  ;;  %372 = vmatprep.mubr.bf16.mxu1 %v1460_v0  ;;  %v1301_v58 = vld [vmem:[#allocation8 + $0x90] sm:$0xff]   ;;  %v1305_v62 = vld [vmem:[#allocation8 + $0x88] sm:$0xff]   ;;  %v1307_v0 = vld [vmem:[#allocation8 + $0xc0] sm:$0xff]  }
  0x44   :  { %v1308_v1 = vld [vmem:[#allocation8] sm:$0xff]   ;;  %v1310_v3 = vld [vmem:[#allocation8 + $0x178] sm:$0xff]  }
  0x45   :  { %314 = vmatpush1.bf16.msra.mxu0 %v1099_v33  ;;  %355 = vmatpush1.bf16.msra.mxu1 %v1101_v34  ;;  %v1309_v2 = vld [vmem:[#allocation8 + $0x80] sm:$0xff]   ;;  %v1311_v4 = vld [vmem:[#allocation8 + $0x1f8] sm:$0xff]  }
  0x46   :  { %1180 = vmatprep.subr.bf16.mxu0 %v1278_v35  ;;  %1202 = vmatprep.subr.bf16.mxu1 %v1279_v36  ;;  %v1511_v8 = vld [vmem:[#allocation7] sm:$0xff] }
  0x47   :  { %v96_v12 = vrot.slane %v1511_v8, %v95_v7  ;;  %v104_v13 = vrot.slane %v1511_v8, %v103_v9  ;;  %v100_v14 = vrot.slane %v1511_v8, %v99_v10  ;;  %v108_v16 = vrot.slane %v1511_v8, %v107_v11  ;;  %v1312_v36 = vld [vmem:[#allocation8 + $0x138] sm:$0xff]  }
  0x48   :  { %1113 = vmatmul.mubr.msk.bf16.vlgmr.msra.gmra.mxu0 %vm213_vm0, %v74_v27  ;;  %1114 = vmatmul.mubr.msk.bf16.vlgmr.msra.gmra.mxu1 %vm213_vm0, %v74_v27  ;;  %v1327_v5 = vld [vmem:[#allocation8 + $0x1d8] sm:$0xff]   ;;  %v119_v9 = vsub.s32 6, %v1508_v6  ;;  %v111_v10 = vsub.s32 4, %v1508_v6  ;;  %v1336_v6 = vld [vmem:[#allocation8 + $0x108] sm:$0xff]  }
  0x49   :  { %1181 = vmatpush3.bf16.msra.mxu0 %v1280_v37  ;;  %1203 = vmatpush3.bf16.msra.mxu1 %v1281_v38  ;;  %v116_v37 = vrot.slane %v1511_v8, %v115_v23  ;;  %v1328_v7 = vld [vmem:[#allocation8 + $0x118] sm:$0xff]   ;;  %v1338_v23 = vld [vmem:[#allocation8 + $0x140] sm:$0xff]  }
  0x4a   :  { %1182 = vmatprep.subr.bf16.mxu0 %v1282_v39  ;;  %1204 = vmatprep.subr.bf16.mxu1 %v1283_v40  ;;  %v1313_v40 = vld [vmem:[#allocation8 + $0x1b8] sm:$0xff]  }
  0x4b   :  { %v1329_v11 = vld [vmem:[#allocation8 + $0x198] sm:$0xff]  }
  0x4d   :  { %1183 = vmatpush3.bf16.msra.mxu0 %v1284_v41  ;;  %1205 = vmatpush3.bf16.msra.mxu1 %v1285_v42  ;;  %v1314_v41 = vld [vmem:[#allocation8 + $0x170] sm:$0xff]  }
  0x4e   :  { %1184 = vmatprep.subr.bf16.mxu0 %v1286_v43  ;;  %1206 = vmatprep.subr.bf16.mxu1 %v1287_v44  ;;  %v124_v43 = vrot.slane %v1511_v8, %v123_v28  ;;  %v1315_v44 = vld [vmem:[#allocation8 + $0x1f0] sm:$0xff]  }
  0x51   :  { %1185 = vmatpush3.bf16.msra.mxu0 %v1288_v45  ;;  %1207 = vmatpush3.bf16.msra.mxu1 %v1289_v46 }
  0x52   :  { %1186 = vmatprep.subr.bf16.mxu0 %v1290_v47  ;;  %1208 = vmatprep.subr.bf16.mxu1 %v1291_v48  ;;  %v1316_v47 = vld [vmem:[#allocation8 + $0x130] sm:$0xff]  }
  0x55   :  { %1187 = vmatpush3.bf16.msra.mxu0 %v1292_v49  ;;  %1209 = vmatpush3.bf16.msra.mxu1 %v1293_v50  ;;  %v1317_v50 = vld [vmem:[#allocation8 + $0x1b0] sm:$0xff]  }
  0x56   :  { %1188 = vmatprep.subr.bf16.mxu0 %v1294_v51  ;;  %1210 = vmatprep.subr.bf16.mxu1 %v1295_v52  ;;  %v1318_v51 = vld [vmem:[#allocation8 + $0x168] sm:$0xff]  }
  0x59   :  { %1189 = vmatpush3.bf16.msra.mxu0 %v1296_v53  ;;  %1211 = vmatpush3.bf16.msra.mxu1 %v1297_v54  ;;  %v1319_v54 = vld [vmem:[#allocation8 + $0x1e8] sm:$0xff]  }
  0x5a   :  { %1190 = vmatprep.subr.bf16.mxu0 %v1298_v55  ;;  %1212 = vmatprep.subr.bf16.mxu1 %v1299_v56 }
  0x5d   :  { %1191 = vmatpush3.bf16.msra.mxu0 %v1300_v57  ;;  %1213 = vmatpush3.bf16.msra.mxu1 %v1301_v58 }
  0x5e   :  { %1192 = vmatprep.subr.bf16.mxu0 %v1302_v59  ;;  %1214 = vmatprep.subr.bf16.mxu1 %v1303_v60  ;;  %v1320_v59 = vld [vmem:[#allocation8 + $0x128] sm:$0xff]  }
  0x61   :  { %1193 = vmatpush3.bf16.msra.mxu0 %v1304_v61  ;;  %1215 = vmatpush3.bf16.msra.mxu1 %v1305_v62  ;;  %v1321_v62 = vld [vmem:[#allocation8 + $0x1a8] sm:$0xff]  }
  0x62   :  { %1194 = vmatprep.subr.bf16.mxu0 %v1306_v63  ;;  %1216 = vmatprep.subr.bf16.mxu1 %v1307_v0  ;;  %v1322_v63 = vld [vmem:[#allocation8 + $0x160] sm:$0xff]  }
  0x65   :  { %1195 = vmatpush3.bf16.msra.mxu0 %v1308_v1  ;;  %1217 = vmatpush3.bf16.msra.mxu1 %v1309_v2  ;;  %v1323_v1 = vld [vmem:[#allocation8 + $0x1e0] sm:$0xff]  }
  0x66   :  { %1224 = vmatprep.subr.bf16.mxu0 %v1310_v3  ;;  %1246 = vmatprep.subr.bf16.mxu1 %v1311_v4  ;;  %v1324_v2 = vld [vmem:[#allocation8 + $0x120] sm:$0xff]   ;;  %v1326_v4 = vld [vmem:[#allocation8 + $0x158] sm:$0xff]  }
  0x67   :  { %v1325_v3 = vld [vmem:[#allocation8 + $0x1a0] sm:$0xff]  }
 0x100   :  { %v251_v15 = vpop.f32.mrf.mxu0  ;;  %v292_v18 = vpop.f32.mrf.mxu1 }
 0x101   :  { %v252_v17 = vadd.f32 %v251_v15, %v96_v12  ;;  %v293_v19 = vadd.f32 %v292_v18, %v104_v13  ;;  %v1330_v12 = vld [vmem:[#allocation8 + $0x150] sm:$0xff]   ;;  %v1334_v18 = vld [vmem:[#allocation8 + $0x148] sm:$0xff]  }
 0x102   :  { %v253_v20 = vpop.f32.mrf.mxu0  ;;  %v294_v22 = vpop.f32.mrf.mxu1  ;;  %v1331_v13 = vld [vmem:[#allocation8 + $0x1d0] sm:$0xff]  }
 0x103   :  { %v254_v21 = vadd.f32 %v253_v20, %v100_v14  ;;  %v381_v24 = vmax.f32 %v252_v17, 0.0  ;;  %v383_v25 = vmax.f32 %v293_v19, 0.0  ;;  %v295_v26 = vadd.f32 %v294_v22, %v108_v16  ;;  %v1332_v15 = vld [vmem:[#allocation8 + $0x110] sm:$0xff]   ;;  %v1335_v19 = vld [vmem:[#allocation8 + $0x1c8] sm:$0xff]  }
 0x104   :  { %v255_v27 = vpop.f32.mrf.mxu0  ;;  %v296_v30 = vpop.f32.mrf.mxu1  ;;  %v120_v14 = vrot.slane %v1511_v8, %v119_v9  ;;  %v112_v16 = vrot.slane %v1511_v8, %v111_v10  ;;  %v1333_v17 = vld [vmem:[#allocation8 + $0x190] sm:$0xff]   ;;  %v1337_v22 = vld [vmem:[#allocation8 + $0x188] sm:$0xff]   ;;  %v1340_v8 = vld [vmem:[#allocation8 + $0x100] sm:$0xff]  }
 0x105   :  { %v382_v29 = vmax.f32 %v254_v21, 0.0  ;;  %v384_v31 = vmax.f32 %v295_v26, 0.0  ;;  %v391_v33 = vpack.c.bf16 %v383_v25, %v383_v25  ;;  %v389_v38 = vpack.c.bf16 %v381_v24, %v381_v24  ;;  %v1339_v24 = vld [vmem:[#allocation8 + $0x1c0] sm:$0xff]  }
 0x106   :  { %v256_v32 = vpop.f32.mrf.mxu0  ;;  %v297_v35 = vpop.f32.mrf.mxu1  ;;  %v1341_v27 = vld [vmem:[#allocation8 + $0x180] sm:$0xff]  }
 0x107   :  { %v390_v34 = vpack.c.bf16 %v382_v29, %v382_v29  ;;  %v392_v39 = vpack.c.bf16 %v384_v31, %v384_v31 }
 0x108   :  { %v1523_v42 = vpop.f32.mrf.mxu0  ;;  %v374_v45 = vpop.f32.mrf.mxu1 }
 0x109   :  { %948 = vmatprep.mubr.bf16.mxu0 %v390_v34  ;;  %988 = vmatprep.mubr.bf16.mxu1 %v392_v39  ;;  %v375_v20 = vadd.f32 %v374_v45, %v120_v14  ;;  %v334_v21 = vadd.f32 %v1523_v42, %v112_v16  ;;  %v1115_v39 = vld [vmem:[%s1541_s4] ss:$0 sm:$0xff]  ;;  %s1424_s4 = scalar_lea.vmem %s1085_s16, 128 }
 0x10a   :  { %949 = vmatmul.mubr.bf16.vlgmr.msra.gmra.mxu0 %v389_v38  ;;  %v335_v46 = vpop.f32.mrf.mxu0  ;;  %989 = vmatmul.mubr.bf16.vlgmr.msra.gmra.mxu1 %v391_v33  ;;  %v376_v49 = vpop.f32.mrf.mxu1  ;;  %p1425_p6 = scmp.ne.s32.totalorder %s1085_s16, %s1424_s4  ;;  %p1430_p8 = scmp.lt.s32.totalorder %s1424_s4, %s1424_s4 }
 0x10b   :  { %1225 = vmatpush3.bf16.msra.mxu0 %v1312_v36  ;;  %v336_v48 = vadd.f32 %v335_v46, %v116_v37  ;;  %1247 = vmatpush3.bf16.msra.mxu1 %v1313_v40  ;;  %v377_v53 = vadd.f32 %v376_v49, %v124_v43  ;;  %v387_v25 = vmax.f32 %v375_v20, 0.0  ;;  %v385_v26 = vmax.f32 %v334_v21, 0.0 }
 0x10c   :  { %1226 = vmatprep.subr.bf16.mxu0 %v1314_v41  ;;  %v337_v52 = vpop.f32.mrf.mxu0  ;;  %1248 = vmatprep.subr.bf16.mxu1 %v1315_v44  ;;  %v378_v56 = vpop.f32.mrf.mxu1  ;;  %p1431_p9 = por %p1430_p8, %p1429_p7 }
 0x10d   :  { %v386_v55 = vmax.f32 %v336_v48, 0.0  ;;  %v388_v57 = vmax.f32 %v377_v53, 0.0  ;;  %v395_v28 = vpack.c.bf16 %v387_v25, %v387_v25  ;;  %v393_v29 = vpack.c.bf16 %v385_v26, %v385_v26 }
 0x10e   :  { %v338_v58 = vpop.f32.mrf.mxu0  ;;  %v379_v61 = vpop.f32.mrf.mxu1  ;;  %p1432_p10 = pnand %p1431_p9, %p1425_p6 }
 0x10f   :  { %1227 = vmatpush3.bf16.msra.mxu0 %v1316_v47  ;;  %v394_v60 = vpack.c.bf16 %v386_v55, %v386_v55  ;;  %1249 = vmatpush3.bf16.msra.mxu1 %v1317_v50  ;;  %v396_v0 = vpack.c.bf16 %v388_v57, %v388_v57 }
 0x110   :  { %1228 = vmatprep.subr.bf16.mxu0 %v1318_v51  ;;  %1250 = vmatprep.subr.bf16.mxu1 %v1319_v54 }
 0x111   :  { %1028 = vmatprep.mubr.bf16.mxu0 %v394_v60  ;;  %1068 = vmatprep.mubr.bf16.mxu1 %v396_v0 }
 0x113   :  { %1229 = vmatpush3.bf16.msra.mxu0 %v1320_v59  ;;  %1251 = vmatpush3.bf16.msra.mxu1 %v1321_v62 }
 0x114   :  { %1230 = vmatprep.subr.bf16.mxu0 %v1322_v63  ;;  %1252 = vmatprep.subr.bf16.mxu1 %v1323_v1 }
 0x117   :  { %1231 = vmatpush3.bf16.msra.mxu0 %v1324_v2  ;;  %1253 = vmatpush3.bf16.msra.mxu1 %v1325_v3 }
 0x118   :  { %1232 = vmatprep.subr.bf16.mxu0 %v1326_v4  ;;  %1254 = vmatprep.subr.bf16.mxu1 %v1327_v5 }
 0x11b   :  { %1233 = vmatpush3.bf16.msra.mxu0 %v1328_v7  ;;  %1255 = vmatpush3.bf16.msra.mxu1 %v1329_v11 }
 0x11c   :  { %1234 = vmatprep.subr.bf16.mxu0 %v1330_v12  ;;  %1256 = vmatprep.subr.bf16.mxu1 %v1331_v13 }
 0x11f   :  { %1235 = vmatpush3.bf16.msra.mxu0 %v1332_v15  ;;  %1257 = vmatpush3.bf16.msra.mxu1 %v1333_v17 }
 0x120   :  { %1236 = vmatprep.subr.bf16.mxu0 %v1334_v18  ;;  %1258 = vmatprep.subr.bf16.mxu1 %v1335_v19 }
 0x123   :  { %1237 = vmatpush3.bf16.msra.mxu0 %v1336_v6  ;;  %1259 = vmatpush3.bf16.msra.mxu1 %v1337_v22 }
 0x124   :  { %1238 = vmatprep.subr.bf16.mxu0 %v1338_v23  ;;  %1260 = vmatprep.subr.bf16.mxu1 %v1339_v24 }
 0x127   :  { %1239 = vmatpush3.bf16.msra.mxu0 %v1340_v8  ;;  %1261 = vmatpush3.bf16.msra.mxu1 %v1341_v27 }
 0x12a   :  { %1029 = vmatmul.mubr.bf16.vlgmr.msra.gmra.mxu0 %v393_v29  ;;  %1069 = vmatmul.mubr.bf16.vlgmr.msra.gmra.mxu1 %v395_v28 }
 0x1ca   :  { %v1196_v30 = vpop.f32.mrf.mxu0  ;;  %v1218_v31 = vpop.f32.mrf.mxu1 }
 0x1cc   :  { %v1197_v32 = vpop.f32.mrf.mxu0  ;;  %v1219_v33 = vpop.f32.mrf.mxu1 }
 0x1cd   :  { %v1198_v38 = vadd.f32 %v1197_v32, %v1196_v30  ;;  %v1220_v42 = vadd.f32 %v1219_v33, %v1218_v31 }
 0x1ce   :  { %v1199_v34 = vpop.f32.mrf.mxu0  ;;  %v1221_v35 = vpop.f32.mrf.mxu1 }
 0x1cf   :  { %v951_v40 = vadd.f32 %v1198_v38, %v1115_v39 }
 0x1d0   :  { %v1200_v36 = vpop.f32.mrf.mxu0  ;;  %v1222_v37 = vpop.f32.mrf.mxu1 }
 0x1d1   :  { %v991_v45 = vadd.f32 %v1220_v42, %v951_v40 }
 0x1ea   :  { %v1240_v41 = vpop.f32.mrf.mxu0  ;;  %v1262_v43 = vpop.f32.mrf.mxu1 }
 0x1ec   :  { %v1241_v44 = vpop.f32.mrf.mxu0  ;;  %v1263_v47 = vpop.f32.mrf.mxu1 }
 0x1ed   :  { %v1242_v46 = vadd.f32 %v1241_v44, %v1240_v41  ;;  %v1264_v50 = vadd.f32 %v1263_v47, %v1262_v43 }
 0x1ee   :  { %v1243_v48 = vpop.f32.mrf.mxu0  ;;  %v1265_v51 = vpop.f32.mrf.mxu1 }
 0x1ef   :  { %v1031_v49 = vadd.f32 %v1242_v46, %v991_v45 }
 0x1f0   :  { %v1244_v52 = vpop.f32.mrf.mxu0  ;;  %v1266_v54 = vpop.f32.mrf.mxu1 }
 0x1f1   :  { %v1071_v53 = vadd.f32 %v1264_v50, %v1031_v49 }
 0x1f3   :  { %1342 = vtanh.f32 %v1071_v53 }
 0x200   :  { %v1343_v55 = vpop.eup %1342 }
 0x201   :  { %1077 = vst [vmem:[#allocation10] sm:$0xff] %v1343_v55 }
 0x202   :  { %1435 = shalt.err (!%p1432_p10)
}
 0x203   :  { %1087 = dma.vmem_to_hbm [thread:$0]  %s1085_s16, 128, %s1542_s5, [#allocation4]  }
 0x204   :  { %1450 = dma.done.wait [#allocation4], 128  }
 0x205   :  { %1451 = vsyncadd [#allocation4], 4294967168 }
 0x206   :  { %1091 = vsyncpa [#allocation3], 1 }
 0x207   :  { %1092 = vsyncpa [#allocation6], 1 }
 0x208   :  { %1093 = vsyncpa [#allocation9], 1 }
 0x209   :  { %1094 = vsyncpa [#allocation4], 1 }

</bundles_post_ra>
